<compile_context>
chip_gen: v5e
topology: v5e:2x2
jax: 0.10.0
libtpu: 0.0.40
codegen_flags: <defaults>
</compile_context>

<pallas_src>
import math
import functools

import jax
import jax.numpy as jnp
from jax.experimental import pallas as pl
from jax.experimental.pallas import tpu as pltpu

ROTATION_SCALE = {0: 1.0, 30: 2.0 / (1.0 + math.sqrt(3.0)),
                  45: 1.0 / math.sqrt(2.0), 60: 2.0 / (1.0 + math.sqrt(3.0)),
                  90: 1.0}
ANGLES = [0.0, 30.0, 45.0, 60.0]
SCALES = [ROTATION_SCALE[int(a)] for a in ANGLES]
BN_EPS = 1e-5


# ---------------------------------------------------------------------------
# Fused Pallas kernel: one grid step = NB batch images, layout (C, NB*H*W).
# ---------------------------------------------------------------------------
def _mrcb_kernel(x_ref, mask_ref, ws_ref, bs_ref, mfwd_ref, mbwd_ref,
                 wm_ref, bm_ref, wf_ref, bf_ref, o_ref, *,
                 W, HW, NB, inter, roll_sign):
    C, WTOT = x_ref.shape                            # WTOT = NB * HW
    x = x_ref[...]                                   # (C, NB*HW) f32
    masks = mask_ref[...]                            # (9, NB*HW) f32 boundary masks

    def shifted(v, k):
        # out[:, p] = v[:, p + dy*W + dx] within each image block (zero outside).
        # Rolls that cross an image boundary only hit positions the mask zeroes,
        # so one roll over the whole lane axis is exact.
        dy, dx = k // 3 - 1, k % 3 - 1
        off = dy * W + dx
        if off == 0:
            return v
        rolled = pltpu.roll(v, (-roll_sign * off) % WTOT, axis=1)
        return rolled * masks[k:k + 1, :]

    def conv3x3_relu(v, w_stack, bias):
        # v: (Cin, WTOT); w_stack: (Cout, 9*Cin) with col = k*Cin + ci; bias: (Cout,1)
        z = jnp.concatenate([shifted(v, k) for k in range(9)], axis=0)  # (9Cin, WTOT)
        acc = jnp.dot(w_stack, z, preferred_element_type=jnp.float32)
        return jnp.maximum(acc + bias, 0.0)

    def warp(v, mt_ref):
        # per-branch composed warp: channel rows [i*inter,(i+1)*inter) of every image
        # in the step are right-multiplied by mt_ref[i] (bf16 operands, f32 acc).
        rows = []
        for i in range(4):
            mti = mt_ref[i]                                  # (HW,HW) bf16, loaded once
            blk = v[i * inter:(i + 1) * inter, :].astype(jnp.bfloat16)
            cols = [jnp.dot(blk[:, n * HW:(n + 1) * HW], mti,
                            preferred_element_type=jnp.float32)
                    for n in range(NB)]
            rows.append(cols[0] if NB == 1 else jnp.concatenate(cols, axis=1))
        return jnp.concatenate(rows, axis=0)                 # (C, WTOT) f32

    # 3x3 average pool, stride 1, pad 1, count_include_pad=True (divisor always 9)
    pooled = x
    for k in range(9):
        if k != 4:
            pooled = pooled + shifted(x, k)
    pooled = pooled * (1.0 / 9.0)

    # stacked 1x1 split convs (+ folded BN) + ReLU -> branch-major channel rows
    h = jnp.maximum(jnp.dot(ws_ref[...], pooled,
                            preferred_element_type=jnp.float32) + bs_ref[...], 0.0)

    g = warp(h, mfwd_ref)                            # scale_i then rotate_i (composed)
    m = conv3x3_relu(g, wm_ref[...], bm_ref[...])    # block-diag stacked mid 3x3 convs
    r = warp(m, mbwd_ref)                            # rotate(360-a_i) then scale(1/s_i)
    # channel concat is implicit in the row layout; final 3x3 conv + ReLU
    o_ref[...] = conv3x3_relu(r, wf_ref[...], bf_ref[...]).astype(o_ref.dtype)


def _probe_roll_sign():
    """Determine pltpu.roll sign convention at runtime (guards jnp.roll parity)."""
    x = jnp.tile(jnp.arange(128, dtype=jnp.float32)[None, :], (8, 1))

    def k(x_ref, o_ref):
        o_ref[...] = pltpu.roll(x_ref[...], 1, 1)

    out = pl.pallas_call(
        k, out_shape=jax.ShapeDtypeStruct((8, 128), jnp.float32))(x)
    return 1 if int(out[0, 0]) == 127 else -1


def _pick_batch_tile(N, HW, lane_budget=1024):
    """Largest divisor of N whose lane footprint NB*HW stays <= lane_budget."""
    nb = 1
    for d in range(1, N + 1):
        if N % d == 0 and d * HW <= lane_budget:
            nb = d
    return nb


def mrcb_forward(x_nchw, ops):
    N, C, H, W = x_nchw.shape
    HW = H * W
    inter = C // 4
    NB = ops["nb"]
    G = N // NB
    WTOT = NB * HW
    # group NB images onto the lane axis: (G, C, NB*HW), image-major column blocks
    x3 = x_nchw.reshape(N, C, HW).astype(jnp.float32)
    xg = x3.reshape(G, NB, C, HW).transpose(0, 2, 1, 3).reshape(G, C, WTOT)
    kernel = functools.partial(_mrcb_kernel, W=W, HW=HW, NB=NB, inter=inter,
                               roll_sign=ops["roll_sign"])
    out = pl.pallas_call(
        kernel,
        out_shape=jax.ShapeDtypeStruct((G, C, WTOT), jnp.float32),
        grid=(G,),
        in_specs=[
            pl.BlockSpec((None, C, WTOT), lambda g: (g, 0, 0)),     # NB-image tile
            pl.BlockSpec((9, WTOT), lambda g: (0, 0)),              # boundary masks
            pl.BlockSpec((C, C), lambda g: (0, 0)),                 # stacked 1x1 W
            pl.BlockSpec((C, 1), lambda g: (0, 0)),                 # stacked 1x1 b
            pl.BlockSpec((4, HW, HW), lambda g: (0, 0, 0)),         # composed fwd warps
            pl.BlockSpec((4, HW, HW), lambda g: (0, 0, 0)),         # composed bwd warps
            pl.BlockSpec((C, 9 * C), lambda g: (0, 0)),             # block-diag mid W
            pl.BlockSpec((C, 1), lambda g: (0, 0)),                 # mid b
            pl.BlockSpec((C, 9 * C), lambda g: (0, 0)),             # final W
            pl.BlockSpec((C, 1), lambda g: (0, 0)),                 # final b
        ],
        out_specs=pl.BlockSpec((None, C, WTOT), lambda g: (g, 0, 0)),
        compiler_params=pltpu.CompilerParams(
            dimension_semantics=("parallel",)),       # v7x: 2 TCs split batch tiles
    )(xg, ops["masks"], ops["w_split"], ops["b_split"], ops["mt_fwd"],
      ops["mt_bwd"], ops["w_mid"], ops["b_mid"], ops["w_fin"], ops["b_fin"])
    return out.reshape(G, C, NB, HW).transpose(0, 2, 1, 3).reshape(N, C, H, W)


# ---------------------------------------------------------------------------
# Offline preparation (plain JAX, data independent): warp matrices, masks,
# folded + stacked weights.
# ---------------------------------------------------------------------------
def build_warp_matrix(H, W, angle_deg, scale):
    # kornia-style center affine warp, bilinear sampling, zero padding, as (HW,HW).
    cy, cx = (H - 1) / 2.0, (W - 1) / 2.0
    th = math.radians(angle_deg)
    cos_t, sin_t = math.cos(th), math.sin(th)
    ii, jj = jnp.meshgrid(jnp.arange(H, dtype=jnp.float32),
                          jnp.arange(W, dtype=jnp.float32), indexing="ij")
    y = ii - cy
    x = jj - cx
    sx = (cos_t * x + sin_t * y) / scale + cx
    sy = (-sin_t * x + cos_t * y) / scale + cy
    x0 = jnp.floor(sx); y0 = jnp.floor(sy)
    x1 = x0 + 1.0;      y1 = y0 + 1.0
    wx = sx - x0;       wy = sy - y0
    HW = H * W
    p_idx = jnp.arange(HW)
    M = jnp.zeros((HW, HW), jnp.float32)

    def scatter(M, ys, xs, w):
        valid = (ys >= 0) & (ys <= H - 1) & (xs >= 0) & (xs <= W - 1)
        q = (jnp.clip(ys, 0, H - 1).astype(jnp.int32) * W
             + jnp.clip(xs, 0, W - 1).astype(jnp.int32)).reshape(-1)
        wv = jnp.where(valid, w, 0.0).reshape(-1)
        return M.at[p_idx, q].add(wv)

    M = scatter(M, y0, x0, (1.0 - wy) * (1.0 - wx))
    M = scatter(M, y0, x1, (1.0 - wy) * wx)
    M = scatter(M, y1, x0, wy * (1.0 - wx))
    M = scatter(M, y1, x1, wy * wx)
    return M


def build_shift_masks(H, W):
    p = jnp.arange(H * W)
    py, px = p // W, p % W
    ms = []
    for dy in (-1, 0, 1):
        for dx in (-1, 0, 1):
            valid = ((py + dy >= 0) & (py + dy < H) &
                     (px + dx >= 0) & (px + dx < W))
            ms.append(valid.astype(jnp.float32))
    return jnp.stack(ms)                              # (9, HW)


def _folded_conv_bn(key, K, cin, cout):
    # Conv2d + BatchNorm2d (eval mode) folded into one conv weight/bias (HWIO).
    kw, kb, kg, kbt, km, kv = jax.random.split(key, 6)
    w = 0.05 * jax.random.normal(kw, (K, K, cin, cout), jnp.float32)
    b = 0.05 * jax.random.normal(kb, (cout,), jnp.float32)
    gamma = 1.0 + 0.1 * jax.random.normal(kg, (cout,), jnp.float32)
    beta = 0.1 * jax.random.normal(kbt, (cout,), jnp.float32)
    mean = 0.1 * jax.random.normal(km, (cout,), jnp.float32)
    var = 1.0 + 0.1 * jax.random.uniform(kv, (cout,), jnp.float32)
    s = gamma / jnp.sqrt(var + BN_EPS)
    return w * s, (b - mean) * s + beta


def init_params(key, in_planes):
    inter = in_planes // 4
    keys = jax.random.split(key, 9)
    return {
        "split": [_folded_conv_bn(keys[i], 1, in_planes, inter) for i in range(4)],
        "mid":   [_folded_conv_bn(keys[4 + i], 3, inter, inter) for i in range(4)],
        "final": _folded_conv_bn(keys[8], 3, in_planes, in_planes),
    }


def prepare_operands(params, N, C, H, W):
    inter = C // 4
    HW = H * W
    nb = _pick_batch_tile(N, HW)
    hi = jax.lax.Precision.HIGHEST

    # stacked 1x1 split convs: (Cout=C, Cin=C), rows branch-major
    w_split = jnp.concatenate(
        [w.reshape(C, inter).T for w, _ in params["split"]], axis=0)
    b_split = jnp.concatenate([b for _, b in params["split"]]).reshape(C, 1)

    # block-diagonal stacked mid 3x3 convs: (C, 9*C), col = k*C + ci
    w_mid = jnp.zeros((C, 9 * C), jnp.float32)
    for i, (w, _) in enumerate(params["mid"]):
        blk = jnp.transpose(w.reshape(9, inter, inter), (2, 0, 1))   # (o, k, ci)
        for k in range(9):
            w_mid = w_mid.at[i * inter:(i + 1) * inter,
                             k * C + i * inter:k * C + (i + 1) * inter].set(blk[:, k, :])
    b_mid = jnp.concatenate([b for _, b in params["mid"]]).reshape(C, 1)

    wf, bf = params["final"]
    w_fin = jnp.transpose(wf.reshape(9, C, C), (2, 0, 1)).reshape(C, 9 * C)
    b_fin = bf.reshape(C, 1)

    # warp matrices; compose scale->rotate (fwd) and rotate_back->unscale (bwd),
    # transpose for the row-vector (channels x HW) layout, store bf16.
    m_scale = [build_warp_matrix(H, W, 0.0, s) for s in SCALES]
    m_rot = [build_warp_matrix(H, W, a, 1.0) for a in ANGLES]
    m_rotb = [build_warp_matrix(H, W, 360.0 - a, 1.0) for a in ANGLES]
    m_scaleb = [build_warp_matrix(H, W, 0.0, 1.0 / s) for s in SCALES]
    mt_fwd = jnp.stack([jnp.matmul(m_rot[i], m_scale[i], precision=hi).T
                        for i in range(4)]).astype(jnp.bfloat16)
    mt_bwd = jnp.stack([jnp.matmul(m_scaleb[i], m_rotb[i], precision=hi).T
                        for i in range(4)]).astype(jnp.bfloat16)

    return dict(masks=jnp.tile(build_shift_masks(H, W), (1, nb)),   # (9, nb*HW)
                nb=nb,
                w_split=w_split, b_split=b_split,
                mt_fwd=mt_fwd, mt_bwd=mt_bwd,
                w_mid=w_mid, b_mid=b_mid, w_fin=w_fin, b_fin=b_fin,
                roll_sign=_probe_roll_sign(),
                ref_mats=dict(scale=m_scale, rot=m_rot,
                              rotb=m_rotb, scaleb=m_scaleb))


# ---------------------------------------------------------------------------
# Pure-JAX reference (uncomposed warps, HIGHEST precision) for validation.
# ---------------------------------------------------------------------------
def reference_forward(x, params, mats):
    hi = jax.lax.Precision.HIGHEST
    N, C, H, W = x.shape

    def conv(v, w, b, K):
        out = jax.lax.conv_general_dilated(
            v, w, (1, 1), [(K // 2, K // 2)] * 2,
            dimension_numbers=("NCHW", "HWIO", "NCHW"), precision=hi)
        return jnp.maximum(out + b[None, :, None, None], 0.0)

    def warp(v, M):
        vf = v.reshape(N, v.shape[1], H * W)
        return jnp.einsum("pq,ncq->ncp", M, vf,
                          precision=hi).reshape(v.shape)

    xp = jnp.pad(x, ((0, 0), (0, 0), (1, 1), (1, 1)))
    pooled = sum(xp[:, :, dy:dy + H, dx:dx + W]
                 for dy in range(3) for dx in range(3)) / 9.0
    outs = []
    for i in range(4):
        w_s, b_s = params["split"][i]
        o = conv(pooled, w_s, b_s, 1)
        o = warp(o, mats["scale"][i])
        o = warp(o, mats["rot"][i])
        w_m, b_m = params["mid"][i]
        o = conv(o, w_m, b_m, 3)
        o = warp(o, mats["rotb"][i])
        o = warp(o, mats["scaleb"][i])
        outs.append(o)
    cat = jnp.concatenate(outs, axis=1)
    w_f, b_f = params["final"]
    return conv(cat, w_f, b_f, 3)


if __name__ == "__main__":
    key = jax.random.PRNGKey(0)
    kx, kp = jax.random.split(key)
    N, C, H, W = 2, 32, 16, 16                        # in_planes=32 -> inter_planes=8
    x = jax.random.normal(kx, (N, C, H, W), jnp.float32)
    params = init_params(kp, C)
    ops = prepare_operands(params, N, C, H, W)

    fwd = jax.jit(lambda xx: mrcb_forward(xx, ops))
    y = fwd(x)
    jax.block_until_ready(y)
    assert y.shape == (N, C, H, W) and y.dtype == jnp.float32

    # correctness check vs a pure-JAX reference (sequential, uncomposed warps)
    ref = reference_forward(x, params, ops["ref_mats"])
    err = float(jnp.max(jnp.abs(y - ref)))
    assert err < 5e-2, f"max abs error vs reference: {err}"
    print("KERNEL_OK")
</pallas_src>

<mosaic_0001>
module attributes {stable_mosaic.version = 11 : i64} {
  func.func @k(%arg0: memref<8x128xf32, #tpu.memory_space<vmem>>, %arg1: memref<8x128xf32, #tpu.memory_space<vmem>>) attributes {dimension_semantics = [], scalar_prefetch = 0 : i64, scratch_operands = 0 : i64, tpu.core_type = #tpu.core_type<tc>} {
    %c0 = arith.constant 0 : index
    %c0_0 = arith.constant 0 : index
    %0 = vector.load %arg0[%c0, %c0_0] : memref<8x128xf32, #tpu.memory_space<vmem>>, vector<8x128xf32>
    %c1_i32 = arith.constant 1 : i32
    %1 = tpu.dynamic_rotate %0 by %c1_i32 dim 1 : vector<8x128xf32>, i32 -> vector<8x128xf32>
    %c0_1 = arith.constant 0 : index
    %c0_2 = arith.constant 0 : index
    %2 = vector.load %arg1[%c0_1, %c0_2] : memref<8x128xf32, #tpu.memory_space<vmem>>, vector<8x128xf32>
    tpu.vector_store %arg1[%c0_1, %c0_2], %1 {strides = array<i32>} : memref<8x128xf32, #tpu.memory_space<vmem>>, vector<8x128xf32>,
    return
  }
}

</mosaic_0001>

<bundles_post_ra>
// kernel: tpu_custom_call.1
= control target key start
LH: loop header
LB: loop body
LE: loop exit
PB: predicated region body
PF: predicated region fallthrough
CT: control target
= control target key end

     0   :  { %6 = vsyncpa [#allocation3], 0  ;;  %s118_s0 = inlined_call_operand.hbm [shape: f32[8,128], index: 0, kind: input, shape index: {}]   ;;  %s119_s1 = inlined_call_operand.hbm [shape: f32[8,128], index: 1, kind: output, shape index: {}]  }
   0x1   :  { %7 = vsyncpa [#allocation4], 0  ;;  %s13_s8 = sshll.u32 %s118_s0, 4  ;;  %s99_s9 = smov [#allocation2]   ;;  %s14_s8 = int_to_ptr.hbm [resolvable:$true] %s13_s8 }
   0x2   :  { %s15_s10 = sshll.u32 %s99_s9, 4  ;;  %s16_s10 = int_to_ptr.vmem [resolvable:$true] %s15_s10 }
   0x3   :  { %18 = dma.hbm_to_vmem [thread:$0]  %s14_s8, 128, %s16_s10, [#allocation3]  }
   0x4   :  { %95 = dma.done.wait [#allocation3], 128  }
   0x5   :  { %96 = vsyncadd [#allocation3], 4294967168  ;;  %v23_v0 = vld [vmem:[#allocation2] sm:$0xff]  ;;  %s100_s11 = smov 1   ;;  %s101_s12 = smov [#allocation5]  }
   0x6   :  { %24 = vrot.lane.b32.xlu0 %v23_v0, %s100_s11  ;;  %s32_s13 = sshll.u32 %s101_s12, 4  ;;  %s34_s16 = sshll.u32 %s119_s1, 4  ;;  %s33_s13 = int_to_ptr.vmem [resolvable:$true] %s32_s13  ;;  %s35_s16 = int_to_ptr.hbm [resolvable:$true] %s34_s16 }
  0x78   :  { %v25_v1 = vpop.permute.xlu0 %24 }
  0x79   :  { %26 = vst [vmem:[#allocation5] sm:$0xff] %v25_v1 }
  0x7a   :  { %37 = dma.vmem_to_hbm [thread:$0]  %s33_s13, 128, %s35_s16, [#allocation4]  }
  0x7b   :  { %97 = dma.done.wait [#allocation4], 128  }
  0x7c   :  { %98 = vsyncadd [#allocation4], 4294967168 }
  0x7d   :  { %42 = vsyncpa [#allocation3], 1 }
  0x7e   :  { %43 = vsyncpa [#allocation4], 1 }

</bundles_post_ra>
